<compile_context>
chip_gen: v6e
topology: v6e:2x2x1
jax: 0.10.0
libtpu: 0.0.40
codegen_flags: <defaults>
</compile_context>

<pallas_src>
import functools

import jax
import jax.numpy as jnp
from jax.experimental import pallas as pl
from jax.experimental.pallas import tpu as pltpu


# ----------------------------- Phase 1: pool + Linear -------------------------


def _pool_linear_kernel(feat_ref, w_ref, b_ref, z_ref):
    # feat_ref: (TB, S, F) any float dtype; w_ref: (F, E) f32; b_ref: (1, E) f32.
    s = feat_ref.shape[1]
    # Adaptive avg-pool to (1,1): mean over the S spatial positions, f32 on the VPU.
    pooled = jnp.sum(feat_ref[...].astype(jnp.float32), axis=1) * (1.0 / s)  # (TB, F)
    # Linear(F -> E) on the MXU with f32 accumulation.
    z = jnp.dot(pooled, w_ref[...], preferred_element_type=jnp.float32) + b_ref[...]
    z_ref[...] = z.astype(z_ref.dtype)


# ----------------------------- Phase 2: BatchNorm1d ---------------------------


def _batch_stats_bn_kernel(z_ref, gamma_ref, beta_ref, o_ref):
    # BatchNorm1d with batch statistics (training mode, eps=1e-5).
    z = z_ref[...]
    mu = jnp.mean(z, axis=0, keepdims=True)
    var = jnp.mean((z - mu) ** 2, axis=0, keepdims=True)   # biased variance
    inv = jax.lax.rsqrt(var + 1e-5)
    o_ref[...] = ((z - mu) * inv * gamma_ref[...] + beta_ref[...]).astype(o_ref.dtype)


def _running_stats_bn_kernel(z_ref, gamma_ref, beta_ref, mean_ref, var_ref, o_ref):
    # BatchNorm1d with running statistics (eval mode).
    inv = jax.lax.rsqrt(var_ref[...] + 1e-5)
    o_ref[...] = ((z_ref[...] - mean_ref[...]) * inv * gamma_ref[...]
                  + beta_ref[...]).astype(o_ref.dtype)


# ----------------------------------- Wrapper ----------------------------------


def _pick_batch_tile(B, S, F, itemsize, budget_bytes=8 << 20):
    """Largest sublane-aligned batch tile whose (TB, S, F) block fits the budget."""
    if B <= 8:
        return B
    tb = (budget_bytes // (S * F * itemsize)) // 8 * 8
    tb = max(8, tb)
    return min(tb, B)


def _pad_last(x, e_pad, value=0.0):
    e = x.shape[-1]
    if e == e_pad:
        return x
    pad = [(0, 0)] * (x.ndim - 1) + [(0, e_pad - e)]
    return jnp.pad(x, pad, constant_values=value)


@functools.partial(jax.jit, static_argnames=("tile_batch",))
def encoder_cnn_forward(feat_nhwc, w, b, gamma, beta,
                        running_mean=None, running_var=None, *, tile_batch=None):
    """feat_nhwc: (B, H, W, F) backbone pre-pool features (NHWC; bf16 recommended).
    w: (F, E) = torch linear weight transposed; b/gamma/beta: (E,).
    running_mean/running_var: optional (E,) for eval-mode BN (else batch stats).
    Returns (B, E) float32 embeddings."""
    B, H, W, F = feat_nhwc.shape
    S = H * W
    E = w.shape[1]
    E_pad = ((E + 127) // 128) * 128

    feats = feat_nhwc.reshape(B, S, F)              # free view for NHWC input

    w_p = _pad_last(w.astype(jnp.float32), E_pad)
    b_p = _pad_last(b.astype(jnp.float32), E_pad).reshape(1, E_pad)
    g_p = _pad_last(gamma.astype(jnp.float32), E_pad).reshape(1, E_pad)
    be_p = _pad_last(beta.astype(jnp.float32), E_pad).reshape(1, E_pad)

    itemsize = jnp.dtype(feats.dtype).itemsize
    TB = tile_batch if tile_batch is not None else _pick_batch_tile(B, S, F, itemsize)
    assert TB == B or TB % 8 == 0, "tile_batch must equal B or be a multiple of 8"
    grid = (pl.cdiv(B, TB),)

    feat_block_bytes = TB * S * F * itemsize
    vmem_bytes = (2 * feat_block_bytes            # double-buffered feature blocks
                  + 2 * F * E_pad * 4             # resident weight (conservative x2)
                  + 2 * TB * E_pad * 4            # output blocks
                  + (2 << 20))                    # headroom
    vmem_limit = min(max(vmem_bytes, 16 << 20), 48 << 20)

    cost = pl.CostEstimate(
        flops=B * S * F + 2 * B * F * E_pad,
        transcendentals=0,
        bytes_accessed=B * S * F * itemsize + F * E_pad * 4 + B * E_pad * 4,
    )

    # Phase 1: pooled Linear, batch-parallel grid, disjoint output tiles.
    z = pl.pallas_call(
        _pool_linear_kernel,
        out_shape=jax.ShapeDtypeStruct((B, E_pad), jnp.float32),
        grid=grid,
        in_specs=[
            pl.BlockSpec((TB, S, F), lambda i: (i, 0, 0)),
            pl.BlockSpec((F, E_pad), lambda i: (0, 0)),
            pl.BlockSpec((1, E_pad), lambda i: (0, 0)),
        ],
        out_specs=pl.BlockSpec((TB, E_pad), lambda i: (i, 0)),
        compiler_params=pltpu.CompilerParams(
            dimension_semantics=("parallel",),
            vmem_limit_bytes=vmem_limit),
        cost_estimate=cost,
    )(feats, w_p, b_p)

    # Phase 2: BatchNorm1d over the (B, E) pre-BN rows (tiny, single block).
    if running_mean is not None and running_var is not None:
        rm = _pad_last(running_mean.astype(jnp.float32), E_pad).reshape(1, E_pad)
        rv = _pad_last(running_var.astype(jnp.float32), E_pad, 1.0).reshape(1, E_pad)
        out = pl.pallas_call(
            _running_stats_bn_kernel,
            out_shape=jax.ShapeDtypeStruct((B, E_pad), jnp.float32),
        )(z, g_p, be_p, rm, rv)
    else:
        out = pl.pallas_call(
            _batch_stats_bn_kernel,
            out_shape=jax.ShapeDtypeStruct((B, E_pad), jnp.float32),
        )(z, g_p, be_p)

    return out[:, :E] if E_pad != E else out


# ---------------------------------- Reference ---------------------------------


def _reference(feat_nhwc, w, b, gamma, beta):
    x = feat_nhwc.astype(jnp.float32)
    pooled = jnp.mean(x, axis=(1, 2))                          # adaptive avg-pool (1,1)
    z = jnp.dot(pooled, w.astype(jnp.float32),
                precision=jax.lax.Precision.HIGHEST) + b       # Linear
    mu = jnp.mean(z, axis=0, keepdims=True)                    # BatchNorm1d (batch stats)
    var = jnp.mean((z - mu) ** 2, axis=0, keepdims=True)
    return gamma * (z - mu) / jnp.sqrt(var + 1e-5) + beta


if __name__ == "__main__":
    key = jax.random.PRNGKey(0)
    k_feat, k_w = jax.random.split(key)

    # Small stand-in for ResNet-152's (B, 7, 7, 2048) NHWC pre-pool features.
    B, H, W, F = 16, 7, 7, 256
    E = 256                                   # embed_size (lane-dense)

    feats = jax.random.normal(k_feat, (B, H, W, F), dtype=jnp.float32).astype(jnp.bfloat16)
    # init_weights(): linear.weight ~ N(0, 0.02), bias = 0.  Stored as (F, E) = W.T.
    w = 0.02 * jax.random.normal(k_w, (F, E), dtype=jnp.float32)
    b = jnp.zeros((E,), jnp.float32)
    gamma = jnp.ones((E,), jnp.float32)       # BatchNorm1d affine defaults
    beta = jnp.zeros((E,), jnp.float32)

    # tile_batch=8 -> grid=(2,): exercises the batch-tiled parallel pipeline.
    out = jax.block_until_ready(
        encoder_cnn_forward(feats, w, b, gamma, beta, tile_batch=8))
    ref = _reference(feats, w, b, gamma, beta)

    assert out.shape == (B, E)
    err = float(jnp.max(jnp.abs(out - ref)))
    assert jnp.allclose(out, ref, atol=2e-2, rtol=2e-2), err
    print("KERNEL_OK")
</pallas_src>

<mosaic_0001>
module attributes {stable_mosaic.version = 11 : i64} {
  func.func @_batch_stats_bn_kernel(%arg0: memref<16x256xf32, #tpu.memory_space<vmem>>, %arg1: memref<1x256xf32, #tpu.memory_space<vmem>>, %arg2: memref<1x256xf32, #tpu.memory_space<vmem>>, %arg3: memref<16x256xf32, #tpu.memory_space<vmem>>) attributes {dimension_semantics = [], scalar_prefetch = 0 : i64, scratch_operands = 0 : i64, tpu.core_type = #tpu.core_type<tc>} {
    %c0 = arith.constant 0 : index
    %c0_0 = arith.constant 0 : index
    %0 = vector.load %arg0[%c0, %c0_0] : memref<16x256xf32, #tpu.memory_space<vmem>>, vector<16x256xf32>
    %cst = arith.constant dense<0.000000e+00> : vector<256xf32>
    %1 = vector.multi_reduction <add>, %0, %cst [0] : vector<16x256xf32> to vector<256xf32>
    %2 = vector.shape_cast %1 : vector<256xf32> to vector<1x256xf32>
    %cst_1 = arith.constant 1.600000e+01 : f32
    %3 = vector.broadcast %cst_1 : f32 to vector<1x256xf32>
    %4 = arith.divf %2, %3 : vector<1x256xf32>
    %5 = vector.broadcast %4 : vector<1x256xf32> to vector<16x256xf32>
    %6 = arith.subf %0, %5 : vector<16x256xf32>
    %7 = arith.mulf %6, %6 : vector<16x256xf32>
    %cst_2 = arith.constant dense<0.000000e+00> : vector<256xf32>
    %8 = vector.multi_reduction <add>, %7, %cst_2 [0] : vector<16x256xf32> to vector<256xf32>
    %9 = vector.shape_cast %8 : vector<256xf32> to vector<1x256xf32>
    %cst_3 = arith.constant 1.600000e+01 : f32
    %10 = vector.broadcast %cst_3 : f32 to vector<1x256xf32>
    %11 = arith.divf %9, %10 : vector<1x256xf32>
    %cst_4 = arith.constant 9.99999974E-6 : f32
    %12 = vector.broadcast %cst_4 : f32 to vector<1x256xf32>
    %13 = arith.addf %11, %12 : vector<1x256xf32>
    %14 = math.rsqrt %13 : vector<1x256xf32>
    %15 = vector.broadcast %4 : vector<1x256xf32> to vector<16x256xf32>
    %16 = arith.subf %0, %15 : vector<16x256xf32>
    %17 = vector.broadcast %14 : vector<1x256xf32> to vector<16x256xf32>
    %18 = arith.mulf %16, %17 : vector<16x256xf32>
    %c0_5 = arith.constant 0 : index
    %c0_6 = arith.constant 0 : index
    %19 = vector.load %arg1[%c0_5, %c0_6] : memref<1x256xf32, #tpu.memory_space<vmem>>, vector<1x256xf32>
    %20 = vector.broadcast %19 : vector<1x256xf32> to vector<16x256xf32>
    %21 = arith.mulf %18, %20 : vector<16x256xf32>
    %c0_7 = arith.constant 0 : index
    %c0_8 = arith.constant 0 : index
    %22 = vector.load %arg2[%c0_7, %c0_8] : memref<1x256xf32, #tpu.memory_space<vmem>>, vector<1x256xf32>
    %23 = vector.broadcast %22 : vector<1x256xf32> to vector<16x256xf32>
    %24 = arith.addf %21, %23 : vector<16x256xf32>
    %c0_9 = arith.constant 0 : index
    %c0_10 = arith.constant 0 : index
    %25 = vector.load %arg3[%c0_9, %c0_10] : memref<16x256xf32, #tpu.memory_space<vmem>>, vector<16x256xf32>
    tpu.vector_store %arg3[%c0_9, %c0_10], %24 {strides = array<i32>} : memref<16x256xf32, #tpu.memory_space<vmem>>, vector<16x256xf32>,
    return
  }
}

module attributes {stable_mosaic.version = 11 : i64} {
  func.func @_pool_linear_kernel(%arg0: i32, %arg1: memref<8x49x256xbf16, #tpu.memory_space<vmem>>, %arg2: memref<256x256xf32, #tpu.memory_space<vmem>>, %arg3: memref<1x256xf32, #tpu.memory_space<vmem>>, %arg4: memref<8x256xf32, #tpu.memory_space<vmem>>) attributes {dimension_semantics = [#tpu.dimension_semantics<parallel>], iteration_bounds = array<i64: 2>, scalar_prefetch = 0 : i64, scratch_operands = 0 : i64, tpu.core_type = #tpu.core_type<tc>, window_params = [{transform_indices = @transform_0, window_bounds = array<i64: 8, 49, 256>}, {pipeline_mode = #tpu.pipeline_mode<synchronous>, transform_indices = @transform_1, window_bounds = array<i64: 256, 256>}, {pipeline_mode = #tpu.pipeline_mode<synchronous>, transform_indices = @transform_2, window_bounds = array<i64: 1, 256>}, {transform_indices = @transform_3, window_bounds = array<i64: 8, 256>}]} {
    %c0 = arith.constant 0 : index
    %c0_0 = arith.constant 0 : index
    %c0_1 = arith.constant 0 : index
    %0 = vector.load %arg1[%c0, %c0_0, %c0_1] : memref<8x49x256xbf16, #tpu.memory_space<vmem>>, vector<8x49x256xbf16>
    %1 = arith.extf %0 : vector<8x49x256xbf16> to vector<8x49x256xf32>
    %cst = arith.constant dense<0.000000e+00> : vector<8x256xf32>
    %2 = vector.multi_reduction <add>, %1, %cst [1] : vector<8x49x256xf32> to vector<8x256xf32>
    %cst_2 = arith.constant 0.0204081628 : f32
    %3 = vector.broadcast %cst_2 : f32 to vector<8x256xf32>
    %4 = arith.mulf %2, %3 : vector<8x256xf32>
    %c0_3 = arith.constant 0 : index
    %c0_4 = arith.constant 0 : index
    %5 = vector.load %arg2[%c0_3, %c0_4] : memref<256x256xf32, #tpu.memory_space<vmem>>, vector<256x256xf32>
    %cst_5 = arith.constant dense<0.000000e+00> : vector<8x256xf32>
    %6 = tpu.matmul %4, %5, %cst_5 {dimension_numbers = #tpu.dot_dimension_numbers<[1], [0], [0], [1], [0, 0, 1, 1], [], []>} : vector<8x256xf32>, vector<256x256xf32>, vector<8x256xf32> -> vector<8x256xf32>
    %c0_6 = arith.constant 0 : index
    %c0_7 = arith.constant 0 : index
    %7 = vector.load %arg3[%c0_6, %c0_7] : memref<1x256xf32, #tpu.memory_space<vmem>>, vector<1x256xf32>
    %8 = vector.broadcast %7 : vector<1x256xf32> to vector<8x256xf32>
    %9 = arith.addf %6, %8 : vector<8x256xf32>
    %c0_8 = arith.constant 0 : index
    %c0_9 = arith.constant 0 : index
    %10 = vector.load %arg4[%c0_8, %c0_9] : memref<8x256xf32, #tpu.memory_space<vmem>>, vector<8x256xf32>
    tpu.vector_store %arg4[%c0_8, %c0_9], %9 {strides = array<i32>} : memref<8x256xf32, #tpu.memory_space<vmem>>, vector<8x256xf32>,
    return
  }
  func.func @transform_0(%arg0: i32) -> (i32, i32, i32) {
    %c0_i32 = arith.constant 0 : i32
    %c0_i32_0 = arith.constant 0 : i32
    %c0_i32_1 = arith.constant 0 : i32
    return %arg0, %c0_i32, %c0_i32_0 : i32, i32, i32
  }
  func.func @transform_1(%arg0: i32) -> (i32, i32) {
    %c0_i32 = arith.constant 0 : i32
    %c0_i32_0 = arith.constant 0 : i32
    %c0_i32_1 = arith.constant 0 : i32
    return %c0_i32, %c0_i32_0 : i32, i32
  }
  func.func @transform_2(%arg0: i32) -> (i32, i32) {
    %c0_i32 = arith.constant 0 : i32
    %c0_i32_0 = arith.constant 0 : i32
    %c0_i32_1 = arith.constant 0 : i32
    return %c0_i32, %c0_i32_0 : i32, i32
  }
  func.func @transform_3(%arg0: i32) -> (i32, i32) {
    %c0_i32 = arith.constant 0 : i32
    %c0_i32_0 = arith.constant 0 : i32
    return %arg0, %c0_i32 : i32, i32
  }
}

</mosaic_0001>

<bundles_post_ra>
// kernel: encoder_cnn_forward.3
= control target key start
LH: loop header
LB: loop body
LE: loop exit
PB: predicated region body
PF: predicated region fallthrough
CT: control target
= control target key end

     0   :  { %s193_s0 = inlined_call_operand.vmem [shape: f32[16,256], index: 0, kind: input, shape index: {}]   ;;  %s194_s1 = inlined_call_operand.vmem [shape: f32[1,256], index: 1, kind: input, shape index: {}]   ;;  %s195_s2 = inlined_call_operand.vmem [shape: f32[1,256], index: 2, kind: input, shape index: {}]   ;;  %s196_s3 = inlined_call_operand.hbm [shape: f32[16,256], index: 3, kind: output, shape index: {}]  }
   0x1   :  { %v15_v0 = vld [vmem:[%s193_s0] sm:$0xff]  ;;  %v17_v1 = vld [vmem:[%s193_s0 + $0x10] sm:$0xff]  ;;  %v16_v3 = vld [vmem:[%s193_s0 + $0x8] sm:$0xff] }
   0x2   :  { %v19_v2 = vadd.f32 %v17_v1, %v15_v0  ;;  %v18_v4 = vld [vmem:[%s193_s0 + $0x18] sm:$0xff] }
   0x3   :  { %v26_v5 = vadd.f32 %v18_v4, %v16_v3 }
   0x4   :  { %8 = vsyncpa [#allocation3], 0  ;;  %v20_v6 = vrot.slane %v19_v2, 4  ;;  %v70_v46 = vlaneseq  ;;  %v68_v49 = vld [vmem:[%s194_s1] sm:$0x3]  ;;  %s149_s23 = smov [#allocation2]  }
   0x5   :  { %v27_v7 = vrot.slane %v26_v5, 4  ;;  %v84_v51 = vld [vmem:[%s195_s2] sm:$0x3]  ;;  %s109_s24 = sshll.u32 %s149_s23, 4  ;;  %s110_s24 = int_to_ptr.vmem [resolvable:$true] %s109_s24 }
   0x6   :  { %v21_v8 = vadd.f32 %v20_v6, %v19_v2  ;;  %v71_v47 = vshrl.u32 %v70_v46, 7  ;;  %s127_s1 = scalar_lea.vmem %s110_s24, 512  ;;  %p132_p1 = scmp.lt.s32.totalorder %s110_s24, %s110_s24 }
   0x7   :  { %v28_v9 = vadd.f32 %v27_v7, %v26_v5  ;;  %p128_p0 = scmp.ne.s32.totalorder %s110_s24, %s127_s1  ;;  %p133_p2 = scmp.lt.s32.totalorder %s127_s1, %s127_s1 }
   0x8   :  { %v22_v10 = vrot.slane %v21_v8, 2  ;;  %v72_v48 = vsub.s32 0, %v71_v47  ;;  %v76_v50 = vsub.s32 1, %v71_v47 }
   0x9   :  { %v29_v11 = vrot.slane %v28_v9, 2  ;;  %p134_p3 = por %p133_p2, %p132_p1 }
   0xa   :  { %v23_v12 = vadd.f32 %v22_v10, %v21_v8  ;;  %v73_v52 = vrot.slane %v68_v49, %v72_v48  ;;  %v77_v54 = vrot.slane %v68_v49, %v76_v50  ;;  %v89_v57 = vrot.slane %v84_v51, %v72_v48 }
   0xb   :  { %v30_v13 = vadd.f32 %v29_v11, %v28_v9  ;;  %v93_v60 = vrot.slane %v84_v51, %v76_v50  ;;  %p135_p4 = pnand %p134_p3, %p128_p0 }
   0xc   :  { %v24_v14 = vrot.slane %v23_v12, 1 }
   0xd   :  { %v31_v15 = vrot.slane %v30_v13, 1 }
   0xe   :  { %v25_v16 = vadd.f32 %v24_v14, %v23_v12 }
   0xf   :  { %v32_v17 = vadd.f32 %v31_v15, %v30_v13 }
  0x10   :  { %v34_v18 = vmul.f32 0.0625, %v25_v16 }
  0x11   :  { %v35_v19 = vmul.f32 0.0625, %v32_v17 }
  0x12   :  { %v36_v20 = vsub.f32 %v15_v0, %v34_v18  ;;  %v38_v21 = vsub.f32 %v17_v1, %v34_v18 }
  0x13   :  { %v37_v22 = vsub.f32 %v16_v3, %v35_v19  ;;  %v39_v23 = vsub.f32 %v18_v4, %v35_v19 }
  0x14   :  { %v40_v24 = vmul.f32 %v36_v20, %v36_v20  ;;  %v42_v25 = vmul.f32 %v38_v21, %v38_v21 }
  0x15   :  { %v41_v26 = vmul.f32 %v37_v22, %v37_v22  ;;  %v43_v27 = vmul.f32 %v39_v23, %v39_v23 }
  0x16   :  { %v44_v28 = vadd.f32 %v42_v25, %v40_v24 }
  0x17   :  { %v51_v29 = vadd.f32 %v43_v27, %v41_v26 }
  0x18   :  { %v45_v30 = vrot.slane %v44_v28, 4 }
  0x19   :  { %v52_v31 = vrot.slane %v51_v29, 4 }
  0x1a   :  { %v46_v32 = vadd.f32 %v45_v30, %v44_v28 }
  0x1b   :  { %v53_v33 = vadd.f32 %v52_v31, %v51_v29 }
  0x1c   :  { %v47_v34 = vrot.slane %v46_v32, 2 }
  0x1d   :  { %v54_v35 = vrot.slane %v53_v33, 2 }
  0x1e   :  { %v48_v36 = vadd.f32 %v47_v34, %v46_v32 }
  0x1f   :  { %v55_v37 = vadd.f32 %v54_v35, %v53_v33 }
  0x20   :  { %v49_v38 = vrot.slane %v48_v36, 1 }
  0x21   :  { %v56_v39 = vrot.slane %v55_v37, 1 }
  0x22   :  { %v50_v40 = vadd.f32 %v49_v38, %v48_v36 }
  0x23   :  { %v57_v41 = vadd.f32 %v56_v39, %v55_v37 }
  0x24   :  { %v58_v42 = vmul.f32 0.0625, %v50_v40 }
  0x25   :  { %v59_v43 = vmul.f32 0.0625, %v57_v41 }
  0x26   :  { %v60_v44 = vadd.f32 1e-05, %v58_v42 }
  0x27   :  { %v61_v45 = vadd.f32 1e-05, %v59_v43 }
  0x28   :  { %123 = vrsqrt.f32 %v60_v44 }
  0x29   :  { %125 = vrsqrt.f32 %v61_v45 }
  0x35   :  { %v124_v53 = vpop.eup %123 }
  0x36   :  { %v126_v55 = vpop.eup %125  ;;  %v64_v56 = vmul.f32 %v124_v53, %v36_v20  ;;  %v66_v58 = vmul.f32 %v124_v53, %v38_v21 }
  0x37   :  { %v65_v59 = vmul.f32 %v126_v55, %v37_v22  ;;  %v67_v61 = vmul.f32 %v126_v55, %v39_v23 }
  0x38   :  { %v80_v62 = vmul.f32 %v73_v52, %v64_v56  ;;  %v82_v63 = vmul.f32 %v73_v52, %v66_v58 }
  0x39   :  { %v81_v0 = vmul.f32 %v77_v54, %v65_v59  ;;  %v83_v1 = vmul.f32 %v77_v54, %v67_v61 }
  0x3a   :  { %v96_v2 = vadd.f32 %v89_v57, %v80_v62  ;;  %v98_v3 = vadd.f32 %v89_v57, %v82_v63 }
  0x3b   :  { %v97_v4 = vadd.f32 %v93_v60, %v81_v0  ;;  %v99_v5 = vadd.f32 %v93_v60, %v83_v1 }
  0x3c   :  { %100 = vst [vmem:[#allocation2] sm:$0xff] %v96_v2  ;;  %102 = vst [vmem:[#allocation2 + $0x10] sm:$0xff] %v98_v3 }
  0x3d   :  { %101 = vst [vmem:[#allocation2 + $0x8] sm:$0xff] %v97_v4  ;;  %103 = vst [vmem:[#allocation2 + $0x18] sm:$0xff] %v99_v5 }
  0x3e   :  { %138 = shalt.err (!%p135_p4)
}
  0x3f   :  { %s150_s2 = smov 256   ;;  %s151_s25 = smov 16  }
  0x40   :  { %115 = dma.vmem_to_hbm [thread:$0]  %s110_s24, 512, %s196_s3, [#allocation3], %s150_s2, %s150_s2, %s151_s25  }
  0x41   :  { %147 = dma.done.wait [#allocation3], 512  }
  0x42   :  { %148 = vsyncadd [#allocation3], 4294966784 }
  0x43   :  { %119 = vsyncpa [#allocation3], 1 }

// kernel: encoder_cnn_forward.2
= control target key start
LH: loop header
LB: loop body
LE: loop exit
PB: predicated region body
PF: predicated region fallthrough
CT: control target
= control target key end

     0   :  { %s861_s12 = smov 0   ;;  %s1521_s0 = inlined_call_operand.vmem [shape: bf16[16,49,256], index: 0, kind: input, shape index: {}]   ;;  %s1522_s1 = inlined_call_operand.vmem [shape: f32[256,256], index: 1, kind: input, shape index: {}]   ;;  %s1523_s2 = inlined_call_operand.vmem [shape: f32[1,256], index: 2, kind: input, shape index: {}]   ;;  %s1524_s3 = inlined_call_operand.vmem [shape: f32[16,256], index: 3, kind: output, shape index: {}]  }
   0x1 LB: > { %s867_s13 = sadd.s32 4294967295, %s839_s12   ;;  %p816_p0 = scmp.ge.s32.totalorder %s839_s12, 1  ;;  %s839_s12 = sphi %s861_s12, %s13_s12  }
   0x2   : > { %p139_p1 = scmp.lt.s32.totalorder %s839_s12, 3 }
   0x4   : > { %p140_p2 = pnand %p816_p0, %p139_p1 }
   0x6   : > { %143 = sbr.rel (%p140_p2) target bundleno = 335 (0x14f), region = 32 }
   0xb   : > { %v600_v0 = vld [vmem:[%s1522_s1 + $0xf8] sm:$0xff]  ;;  %v599_v1 = vld [vmem:[%s1522_s1 + $0xf0] sm:$0xff]  ;;  %v598_v2 = vld [vmem:[%s1522_s1 + $0xe8] sm:$0xff]  ;;  %s817_s26 = sshll.u32 %s867_s13, 3  ;;  %vm349_vm0 = vcmask 1040384   ;;  %vm661_vm1 = vcmask 1041409  }
   0xc   : > { %684 = vmatprep.subr.mxu0 %v600_v0  ;;  %v597_v3 = vld [vmem:[%s1522_s1 + $0xe0] sm:$0xff]  ;;  %v596_v4 = vld [vmem:[%s1522_s1 + $0xd8] sm:$0xff]  ;;  %v595_v5 = vld [vmem:[%s1522_s1 + $0xd0] sm:$0xff]  ;;  %p165_p3 = scmp.lt.s32.totalorder %s817_s26, 15  ;;  %vm663_vm2 = vcmask 1042434   ;;  %vm665_vm3 = vcmask 1043459  }
   0xd   : > { %685 = vmatpush1.msra.mxu0 %v599_v1  ;;  %v594_v6 = vld [vmem:[%s1522_s1 + $0xc8] sm:$0xff]  ;;  %v593_v7 = vld [vmem:[%s1522_s1 + $0xc0] sm:$0xff]  ;;  %v592_v8 = vld [vmem:[%s1522_s1 + $0xb8] sm:$0xff]  ;;  %vm667_vm4 = vcmask 1044484   ;;  %vm669_vm5 = vcmask 1045509   ;;  %vm671_vm6 = vcmask 1046534  }
   0xe   : > { %686 = vmatprep.subr.mxu0 %v598_v2  ;;  %v591_v9 = vld [vmem:[%s1522_s1 + $0xb0] sm:$0xff]  ;;  %v590_v10 = vld [vmem:[%s1522_s1 + $0xa8] sm:$0xff]  ;;  %v589_v11 = vld [vmem:[%s1522_s1 + $0xa0] sm:$0xff]  ;;  %s1677_s26 = smov (!%p165_p3, %s817_s26), 15  ;;  %vm673_vm7 = vcmask 1047559   ;;  %p171_p4 = scmp.lt.s32.totalorder %s867_s13, 1 }
   0xf   : > { %687 = vmatpush1.msra.mxu0 %v597_v3  ;;  %v588_v12 = vld [vmem:[%s1522_s1 + $0x98] sm:$0xff]  ;;  %v587_v13 = vld [vmem:[%s1522_s1 + $0x90] sm:$0xff]  ;;  %v586_v14 = vld [vmem:[%s1522_s1 + $0x88] sm:$0xff]  ;;  %s824_s24 = smul.u32 56, %s1677_s26 }
  0x10   : > { %688 = vmatprep.subr.mxu0 %v596_v4  ;;  %v585_v15 = vld [vmem:[%s1522_s1 + $0x80] sm:$0xff]  ;;  %v584_v16 = vld [vmem:[%s1522_s1 + $0x78] sm:$0xff]  ;;  %v583_v17 = vld [vmem:[%s1522_s1 + $0x70] sm:$0xff]  ;;  %s1679_s13 = smov (!%p171_p4, %s867_s13), 1 }
  0x11   : > { %689 = vmatpush1.msra.mxu0 %v595_v5  ;;  %v582_v18 = vld [vmem:[%s1522_s1 + $0x68] sm:$0xff]  ;;  %v581_v19 = vld [vmem:[%s1522_s1 + $0x60] sm:$0xff]  ;;  %v580_v20 = vld [vmem:[%s1522_s1 + $0x58] sm:$0xff]  ;;  %s938_s8 = scalar_lea.vmem %s1521_s0, %s824_s24  ;;  %s823_s25 = sshll.u32 %s1679_s13, 4 }
  0x12   : > { %690 = vmatprep.subr.mxu0 %v594_v6  ;;  %v579_v21 = vld [vmem:[%s1522_s1 + $0x50] sm:$0xff]  ;;  %v578_v22 = vld [vmem:[%s1522_s1 + $0x48] sm:$0xff]  ;;  %v577_v23 = vld [vmem:[%s1522_s1 + $0x40] sm:$0xff]  ;;  %s175_s29 = scalar_lea.vmem %s1524_s3, %s823_s25 }
  0x13   : > { %691 = vmatpush1.msra.mxu0 %v593_v7  ;;  %v576_v24 = vld [vmem:[%s1522_s1 + $0x38] sm:$0xff]  ;;  %v575_v25 = vld [vmem:[%s1522_s1 + $0x30] sm:$0xff]  ;;  %v956_v26 = vld [vmem:[%s938_s8] sm:$0xff] }
  0x14   : > { %692 = vmatprep.subr.mxu0 %v592_v8  ;;  %1559 = vst [vmem:[#allocation2_spill] sm:$0xff] %v956_v26  ;;  %v959_v27 = vld [vmem:[%s938_s8 + $0x8] sm:$0xff]  ;;  %v965_v29 = vld [vmem:[%s938_s8 + $0x10] sm:$0xff]  ;;  %v968_v30 = vld [vmem:[%s938_s8 + $0x18] sm:$0xff]  ;;  %v233_v32 = vunpack.c.h.bf16 %v956_v26 }
  0x15   : > { %693 = vmatpush1.msra.mxu0 %v591_v9  ;;  %1560 = vst [vmem:[#allocation3_spill] sm:$0xff] %v959_v27  ;;  %v574_v28 = vld [vmem:[%s1522_s1 + $0x28] sm:$0xff]  ;;  %1561 = vst [vmem:[#allocation4_spill] sm:$0xff] %v965_v29  ;;  %v971_v31 = vld [vmem:[%s938_s8 + $0x20] sm:$0xff]  ;;  %v235_v33 = vunpack.c.h.bf16 %v959_v27  ;;  %v237_v40 = vunpack.c.h.bf16 %v965_v29  ;;  %v239_v41 = vunpack.c.h.bf16 %v968_v30 }
  0x16   : > { %694 = vmatprep.subr.mxu0 %v590_v10  ;;  %1562 = vst [vmem:[#allocation5_spill] sm:$0xff] %v968_v30  ;;  %v573_v36 = vld [vmem:[%s1522_s1 + $0x20] sm:$0xff]  ;;  %v981_v37 = vld [vmem:[%s938_s8 + $0x28] sm:$0xff]  ;;  %v984_v38 = vld [vmem:[%s938_s8 + $0x30] sm:$0x11]  ;;  %v241_v42 = vunpack.c.h.bf16 %v971_v31 }
  0x17   : > { %695 = vmatpush1.msra.mxu0 %v589_v11  ;;  %v987_v39 = vld [vmem:[%s938_s8 + $0x38] sm:$0xff]  ;;  %v997_v45 = vld [vmem:[%s938_s8 + $0x40] sm:$0xff]  ;;  %v1000_v46 = vld [vmem:[%s938_s8 + $0x48] sm:$0xff]  ;;  %v243_v48 = vunpack.c.h.bf16 %v981_v37  ;;  %v245_v49 = vunpack.c.h.bf16 %v984_v38  ;;  %v358_v51 = vadd.f32 %v235_v33, %v233_v32 }
  0x18   : > { %696 = vmatprep.subr.mxu0 %v588_v12  ;;  %v572_v44 = vld [vmem:[%s1522_s1 + $0x18] sm:$0xff]  ;;  %1563 = vst [vmem:[#allocation6_spill] sm:$0xff] %v1000_v46  ;;  %v1003_v47 = vld [vmem:[%s938_s8 + $0x50] sm:$0xff]  ;;  %v247_v50 = vunpack.c.h.bf16 %v987_v39  ;;  %v1015_v54 = vld [vmem:[%s938_s8 + $0x60] sm:$0xff]  ;;  %v249_v56 = vunpack.c.h.bf16 %v997_v45  ;;  %v251_v57 = vunpack.c.h.bf16 %v1000_v46 }
  0x19   : > { %697 = vmatpush1.msra.mxu0 %v587_v13  ;;  %1564 = vst [vmem:[#allocation7_spill] sm:$0xff] %v1003_v47  ;;  %v571_v52 = vld [vmem:[%s1522_s1 + $0x10] sm:$0xff]  ;;  %v1012_v53 = vld [vmem:[%s938_s8 + $0x58] sm:$0xff]  ;;  %1566 = vst [vmem:[#allocation9_spill] sm:$0xff] %v1015_v54  ;;  %v253_v58 = vunpack.c.h.bf16 %v1003_v47  ;;  %v359_v3 = vadd.f32 %v358_v51, %v237_v40  ;;  %v1055_v11 = vsel %vm349_vm0, %v245_v49, 0.0 }
  0x1a   : > { %698 = vmatprep.subr.mxu0 %v586_v14  ;;  %1565 = vst [vmem:[#allocation8_spill] sm:$0xff] %v1012_v53  ;;  %v1018_v55 = vld [vmem:[%s938_s8 + $0x68] sm:$0x11]  ;;  %v1028_v61 = vld [vmem:[%s938_s8 + $0x70] sm:$0xff]  ;;  %v1031_v62 = vld [vmem:[%s938_s8 + $0x78] sm:$0xff]  ;;  %v255_v0 = vunpack.c.h.bf16 %v1012_v53  ;;  %v384_v32 = vadd.f32 %v249_v56, %v247_v50 }
  0x1b   : > { %699 = vmatpush1.msra.mxu0 %v585_v15  ;;  %1567 = vst [vmem:[#allocation10_spill] sm:$0xff] %v1018_v55  ;;  %v570_v60 = vld [vmem:[%s1522_s1 + $0x8] sm:$0xff]  ;;  %1568 = vst [vmem:[#allocation11_spill] sm:$0xff] %v1031_v62  ;;  %v1034_v63 = vld [vmem:[%s938_s8 + $0x80] sm:$0xff] }
  0x1c   : > { %700 = vmatprep.subr.mxu0 %v584_v16  ;;  %v569_v4 = vld [vmem:[%s1522_s1] sm:$0xff]  ;;  %v1043_v5 = vld [vmem:[%s938_s8 + $0x88] sm:$0xff]  ;;  %v1046_v6 = vld [vmem:[%s938_s8 + $0x90] sm:$0xff] }
  0x1d   : > { %701 = vmatpush1.msra.mxu0 %v583_v17  ;;  %v1049_v7 = vld [vmem:[%s938_s8 + $0x98] sm:$0xff]  ;;  %v1061_v13 = vld [vmem:[%s938_s8 + $0xa0] sm:$0x11]  ;;  %v1064_v14 = vld [vmem:[%s938_s8 + $0xa8] sm:$0xff] }
  0x1e   : > { %702 = vmatprep.subr.mxu0 %v582_v18  ;;  %v632_v12 = vld [vmem:[%s1522_s1 + $0x1f8] sm:$0xff]  ;;  %1569 = vst [vmem:[#allocation12_spill] sm:$0xff] %v1064_v14  ;;  %v1067_v15 = vld [vmem:[%s938_s8 + $0xb0] sm:$0xff]  ;;  %v630_v33 = vld [vmem:[%s1522_s1 + $0x1e8] sm:$0xff]  ;;  %v1591_v47 = vunpack.c.h.bf16 %v1061_v13 }
  0x1f   : > { %703 = vmatpush1.msra.mxu0 %v581_v19  ;;  %1570 = vst [vmem:[#allocation13_spill] sm:$0xff] %v1067_v15  ;;  %v360_v19 = vadd.f32 %v359_v3, %v239_v41  ;;  %v1094_v40 = vld [vmem:[%s938_s8 + $0xd8] sm:$0x11]  ;;  %v1097_v41 = vld [vmem:[%s938_s8 + $0xe0] sm:$0xff]  ;;  %v1108_v56 = vld [vmem:[%s938_s8 + $0xe8] sm:$0xff] }
  0x20   : > { %704 = vmatprep.subr.mxu0 %v580_v20  ;;  %v631_v20 = vld [vmem:[%s1522_s1 + $0x1f0] sm:$0xff]  ;;  %1571 = vst [vmem:[#allocation14_spill] sm:$0xff] %v1094_v40  ;;  %1572 = vst [vmem:[#allocation15_spill] sm:$0xff] %v1097_v41  ;;  %v1114_v59 = vld [vmem:[%s938_s8 + $0xf8] sm:$0xff] }
  0x21   : > { %705 = vmatpush1.msra.mxu0 %v579_v21  ;;  %v1076_v21 = vld [vmem:[%s938_s8 + $0xb8] sm:$0xff]  ;;  %v361_v51 = vadd.f32 %v360_v19, %v241_v42  ;;  %1573 = vst [vmem:[#allocation16_spill] sm:$0xff] %v1108_v56  ;;  %v1111_v3 = vld [vmem:[%s938_s8 + $0xf0] sm:$0xff]  ;;  %v1123_v34 = vld [vmem:[%s938_s8 + $0x100] sm:$0xff] }
  0x22   : > { %706 = vmatprep.subr.mxu0 %v578_v22  ;;  %v1079_v22 = vld [vmem:[%s938_s8 + $0xc0] sm:$0xff]  ;;  %v628_v19 = vld [vmem:[%s1522_s1 + $0x1d8] sm:$0xff]  ;;  %v1126_v18 = vld [vmem:[%s938_s8 + $0x108] sm:$0xff] }
  0x23   : > { %707 = vmatpush1.msra.mxu0 %v577_v23  ;;  %v1082_v23 = vld [vmem:[%s938_s8 + $0xc8] sm:$0xff]  ;;  %1574 = vst [vmem:[#allocation17_spill] sm:$0xff] %v1126_v18  ;;  %v1129_v50 = vld [vmem:[%s938_s8 + $0x110] sm:$0x11]  ;;  %v1140_v49 = vld [vmem:[%s938_s8 + $0x118] sm:$0xff] }
  0x24   : > { %708 = vmatprep.subr.mxu0 %v576_v24  ;;  %1575 = vst [vmem:[#allocation18_spill] sm:$0xff] %v1129_v50  ;;  %1576 = vst [vmem:[#allocation19_spill] sm:$0xff] %v1140_v49  ;;  %v1143_v16 = vld [vmem:[%s938_s8 + $0x120] sm:$0xff]  ;;  %v1157_v10 = vld [vmem:[%s938_s8 + $0x130] sm:$0xff] }
  0x25   : > { %709 = vmatpush1.msra.mxu0 %v575_v25  ;;  %1577 = vst [vmem:[#allocation20_spill] sm:$0xff] %v1143_v16  ;;  %v1160_v43 = vld [vmem:[%s938_s8 + $0x138] sm:$0xff]  ;;  %v1163_v42 = vld [vmem:[%s938_s8 + $0x140] sm:$0xff]  ;;  %v1176_v35 = vld [vmem:[%s938_s8 + $0x150] sm:$0xff] }
  0x26   : > { %710 = vmatprep.subr.mxu0 %v574_v28  ;;  %1578 = vst [vmem:[#allocation21_spill] sm:$0xff] %v1163_v42  ;;  %1580 = vst [vmem:[#allocation23_spill] sm:$0xff] %v1176_v35  ;;  %v1179_v28 = vld [vmem:[%s938_s8 + $0x158] sm:$0xff]  ;;  %v1193_v25 = vld [vmem:[%s938_s8 + $0x168] sm:$0xff] }
  0x27   : > { %711 = vmatpush1.msra.mxu0 %v573_v36  ;;  %v1091_v36 = vld [vmem:[%s938_s8 + $0xd0] sm:$0xff]  ;;  %1581 = vst [vmem:[#allocation24_spill] sm:$0xff] %v1179_v28  ;;  %v1205_v24 = vld [vmem:[%s938_s8 + $0x178] sm:$0xff]  ;;  %v1208_v9 = vld [vmem:[%s938_s8 + $0x180] sm:$0x11] }
  0x28   : > { %712 = vmatprep.subr.mxu0 %v572_v44  ;;  %v1146_v44 = vld [vmem:[%s938_s8 + $0x128] sm:$0xff]  ;;  %1583 = vst [vmem:[#allocation26_spill] sm:$0xff] %v1208_v9  ;;  %v1219_v27 = vld [vmem:[%s938_s8 + $0x190] sm:$0xff]  ;;  %v1222_v26 = vld [vmem:[%s938_s8 + $0x198] sm:$0xff] }
  0x29   : > { %713 = vmatpush1.msra.mxu0 %v571_v52  ;;  %v629_v52 = vld [vmem:[%s1522_s1 + $0x1e0] sm:$0xff]  ;;  %v1211_v8 = vld [vmem:[%s938_s8 + $0x188] sm:$0xff]  ;;  %1585 = vst [vmem:[#allocation27_spill] sm:$0xff] %v1219_v27  ;;  %v1234_v30 = vld [vmem:[%s938_s8 + $0x1b0] sm:$0xff] }
  0x2a   : > { %714 = vmatprep.subr.mxu0 %v570_v60  ;;  %v385_v60 = vadd.f32 %v384_v32, %v251_v57  ;;  %v627_v32 = vld [vmem:[%s1522_s1 + $0x1d0] sm:$0xff]  ;;  %v1231_v1 = vld [vmem:[%s938_s8 + $0x1a8] sm:$0xff]  ;;  %1586 = vst [vmem:[#allocation28_spill] sm:$0xff] %v1234_v30 }
  0x2b   : > { %715 = vmatpush1.msra.mxu0 %v569_v4  ;;  %v362_v4 = vadd.f32 %v361_v51, %v243_v48  ;;  %v626_v51 = vld [vmem:[%s1522_s1 + $0x1c8] sm:$0xff]  ;;  %v1196_v57 = vld [vmem:[%s938_s8 + $0x170] sm:$0xff] }
  0x2c   : > { %716 = vmatprep.subr.mxu0 %v632_v12  ;;  %v386_v12 = vadd.f32 %v385_v60, %v253_v58  ;;  %v625_v60 = vld [vmem:[%s1522_s1 + $0x1c0] sm:$0xff]  ;;  %v1173_v48 = vld [vmem:[%s938_s8 + $0x148] sm:$0x11] }
  0x2d   : > { %717 = vmatpush2.msra.mxu0 %v631_v20  ;;  %v364_v20 = vadd.f32 %v1055_v11, %v362_v4  ;;  %1579 = vst [vmem:[#allocation22_spill] sm:$0xff] %v1173_v48  ;;  %v624_v4 = vld [vmem:[%s1522_s1 + $0x1b8] sm:$0xff]  ;;  %v1190_v58 = vld [vmem:[%s938_s8 + $0x160] sm:$0xff]  ;;  %v315_v17 = vunpack.c.h.bf16 %v1173_v48  ;;  %v317_v11 = vunpack.c.h.bf16 %v1176_v35  ;;  %v329_v48 = vunpack.c.h.bf16 %v1208_v9 }
  0x2e   : > { %718 = vmatprep.subr.mxu0 %v630_v33  ;;  %v387_v33 = vadd.f32 %v386_v12, %v255_v0  ;;  %1582 = vst [vmem:[#allocation25_spill] sm:$0xff] %v1190_v58  ;;  %v319_v0 = vunpack.c.h.bf16 %v1179_v28  ;;  %v623_v12 = vld [vmem:[%s1522_s1 + $0x1b0] sm:$0xff]  ;;  %v321_v2 = vunpack.c.h.bf16 %v1190_v58  ;;  %v1225_v28 = vld [vmem:[%s938_s8 + $0x1a0] sm:$0xff]  ;;  %v1588_v35 = vunpack.c.h.bf16 %v1018_v55 }
  0x2f   : > { %719 = vmatpush2.msra.mxu0 %v629_v52  ;;  %v365_v52 = vrot.slane %v364_v20, 4 }
  0x30   : > { %720 = vmatprep.subr.mxu0 %v628_v19  ;;  %v1584_v19 = vunpack.c.h.bf16 %v1015_v54  ;;  %v389_v9 = vsel %vm349_vm0, %v1588_v35, 0.0  ;;  %v621_v54 = vld [vmem:[%s1522_s1 + $0x1a0] sm:$0xff]  ;;  %v1589_v35 = vunpack.c.h.bf16 %v1028_v61 }
  0x31   : > { %721 = vmatpush2.msra.mxu0 %v627_v32  ;;  %v366_v53 = vadd.f32 %v365_v52, %v364_v20  ;;  %v333_v32 = vunpack.c.h.bf16 %v1219_v27  ;;  %v415_v20 = vsel %vm349_vm0, %v1591_v47, 0.0  ;;  %v1592_v52 = vunpack.c.h.bf16 %v1064_v14 }
  0x32   : > { %v388_v29 = vadd.f32 %v387_v33, %v1584_v19  ;;  %722 = vmatprep.subr.mxu0 %v626_v51  ;;  %v1237_v33 = vld [vmem:[%s938_s8 + $0x1b8] sm:$0x11]  ;;  %v622_v51 = vld [vmem:[%s1522_s1 + $0x1a8] sm:$0xff]  ;;  %v1597_v14 = vunpack.c.h.bf16 %v1129_v50  ;;  %v1602_v50 = vunpack.c.h.bf16 %v1111_v3 }
  0x33   : > { %1587 = vst [vmem:[#allocation29_spill] sm:$0xff] %v1237_v33  ;;  %723 = vmatpush2.msra.mxu0 %v625_v60  ;;  %v343_v58 = vunpack.c.h.bf16 %v1237_v33  ;;  %v367_v27 = vrot.slane %v366_v53, 2  ;;  %v1590_v60 = vunpack.c.h.bf16 %v1031_v62  ;;  %v1593_v33 = vunpack.c.h.bf16 %v1067_v15 }
  0x34   : > { %724 = vmatprep.subr.mxu0 %v624_v4  ;;  %v390_v19 = vadd.f32 %v389_v9, %v388_v29  ;;  %v620_v4 = vld [vmem:[%s1522_s1 + $0x198] sm:$0xff]  ;;  %v1594_v9 = vunpack.c.h.bf16 %v1094_v40  ;;  %v467_v15 = vsel %vm349_vm0, %v1597_v14, 0.0  ;;  %v618_v14 = vld [vmem:[%s1522_s1 + $0x188] sm:$0xff]  ;;  %v493_v40 = vsel %vm349_vm0, %v315_v17, 0.0 }
  0x35   : > { %v410_v55 = vadd.f32 %v1590_v60, %v1589_v35  ;;  %v436_v46 = vadd.f32 %v1593_v33, %v1592_v52  ;;  %725 = vmatpush2.msra.mxu0 %v623_v12  ;;  %v368_v29 = vadd.f32 %v367_v27, %v366_v53  ;;  %v1595_v35 = vunpack.c.h.bf16 %v1097_v41  ;;  %v619_v12 = vld [vmem:[%s1522_s1 + $0x190] sm:$0xff]  ;;  %v616_v17 = vld [vmem:[%s1522_s1 + $0x178] sm:$0xff] }
  0x36   : > { %v441_v62 = vsel %vm349_vm0, %v1594_v9, 0.0  ;;  %v1596_v60 = vunpack.c.h.bf16 %v1108_v56  ;;  %726 = vmatprep.subr.mxu0 %v622_v51  ;;  %v391_v33 = vrot.slane %v390_v19, 4  ;;  %v1598_v27 = vunpack.c.h.bf16 %v1034_v63 }
  0x37   : > { %v1599_v52 = vunpack.c.h.bf16 %v1076_v21  ;;  %v1600_v41 = vunpack.c.h.bf16 %v1140_v49  ;;  %727 = vmatpush2.msra.mxu0 %v621_v54  ;;  %v369_v51 = vrot.slane %v368_v29, 1 }
  0x38   : > { %v462_v47 = vadd.f32 %v1596_v60, %v1595_v35  ;;  %v411_v53 = vadd.f32 %v410_v55, %v1598_v27  ;;  %v1601_v35 = vunpack.c.h.bf16 %v1143_v16  ;;  %v514_v55 = vadd.f32 %v319_v0, %v317_v11  ;;  %728 = vmatprep.subr.mxu0 %v620_v4 }
  0x39   : > { %v437_v9 = vadd.f32 %v436_v46, %v1599_v52  ;;  %v617_v46 = vld [vmem:[%s1522_s1 + $0x180] sm:$0xff]  ;;  %v392_v27 = vadd.f32 %v391_v33, %v390_v19  ;;  %v1604_v52 = vunpack.c.h.bf16 %v1079_v22  ;;  %v1605_v16 = vunpack.c.h.bf16 %v1146_v44  ;;  %729 = vmatpush2.msra.mxu0 %v619_v12 }
  0x3a   : > { %v488_v60 = vadd.f32 %v1601_v35, %v1600_v41  ;;  %v463_v56 = vadd.f32 %v462_v47, %v1602_v50  ;;  %v1603_v41 = vunpack.c.h.bf16 %v1043_v5  ;;  %v370_v50 = vadd.f32 %v369_v51, %v368_v29  ;;  %730 = vmatprep.subr.mxu0 %v618_v14  ;;  %v615_v47 = vld [vmem:[%s1522_s1 + $0x170] sm:$0xff] }
  0x3b   : > { %v438_v35 = vadd.f32 %v437_v9, %v1604_v52  ;;  %v1606_v11 = vunpack.c.h.bf16 %v1114_v59  ;;  %v515_v4 = vadd.f32 %v514_v55, %v321_v2  ;;  %v519_v19 = vsel %vm349_vm0, %v329_v48, 0.0  ;;  %731 = vmatpush2.msra.mxu0 %v617_v46  ;;  %v614_v2 = vld [vmem:[%s1522_s1 + $0x168] sm:$0xff] }
  0x3c   : > { %v412_v54 = vadd.f32 %v411_v53, %v1603_v41  ;;  %v489_v49 = vadd.f32 %v488_v60, %v1605_v16  ;;  %v393_v33 = vrot.slane %v392_v27, 2  ;;  %v1607_v16 = vunpack.c.h.bf16 %v1046_v6  ;;  %732 = vmatprep.subr.mxu0 %v616_v17 }
  0x3d   : > { %v464_v0 = vadd.f32 %v463_v56, %v1606_v11  ;;  %v1608_v53 = vunpack.c.h.bf16 %v1082_v23  ;;  %v1609_v29 = vunpack.c.h.bf16 %v1157_v10  ;;  %v1610_v56 = vunpack.c.h.bf16 %v1123_v34  ;;  %733 = vmatpush2.msra.mxu0 %v615_v47 }
  0x3e   : > { %v413_v12 = vadd.f32 %v412_v54, %v1607_v16  ;;  %v1611_v14 = vunpack.c.h.bf16 %v1193_v25  ;;  %v1612_v55 = vunpack.c.h.bf16 %v1211_v8  ;;  %v545_v54 = vsel %vm349_vm0, %v343_v58, 0.0  ;;  %v612_v58 = vld [vmem:[%s1522_s1 + $0x158] sm:$0xff]  ;;  %734 = vmatprep.subr.mxu0 %v614_v2 }
  0x3f   : > { %v439_v9 = vadd.f32 %v438_v35, %v1608_v53  ;;  %v490_v60 = vadd.f32 %v489_v49, %v1609_v29  ;;  %v465_v48 = vadd.f32 %v464_v0, %v1610_v56  ;;  %v613_v49 = vld [vmem:[%s1522_s1 + $0x160] sm:$0xff]  ;;  %v394_v46 = vadd.f32 %v393_v33, %v392_v27 }
  0x40   : > { %v516_v51 = vadd.f32 %v515_v4, %v1611_v14  ;;  %v540_v41 = vadd.f32 %v333_v32, %v1612_v55  ;;  %v1613_v52 = vunpack.c.h.bf16 %v1049_v7  ;;  %v1614_v11 = vunpack.c.h.bf16 %v1091_v36  ;;  %735 = vmatpush2.msra.mxu0 %v613_v49 }
  0x41   : > { %v1615_v16 = vunpack.c.h.bf16 %v1160_v43  ;;  %v1616_v32 = vunpack.c.h.bf16 %v1126_v18  ;;  %v1617_v53 = vunpack.c.h.bf16 %v1196_v57  ;;  %v1618_v33 = vunpack.c.h.bf16 %v1222_v26  ;;  %736 = vmatprep.subr.mxu0 %v612_v58 }
  0x42   : > { %v414_v35 = vadd.f32 %v413_v12, %v1613_v52  ;;  %v440_v0 = vadd.f32 %v439_v9, %v1614_v11  ;;  %v554_v29 = vmul.f32 0.020408163, %v370_v50  ;;  %v611_v9 = vld [vmem:[%s1522_s1 + $0x150] sm:$0xff]  ;;  %v395_v47 = vrot.slane %v394_v46, 1 }
  0x43   : > { %v491_v4 = vadd.f32 %v490_v60, %v1615_v16  ;;  %v466_v17 = vadd.f32 %v465_v48, %v1616_v32  ;;  %v517_v27 = vadd.f32 %v516_v51, %v1617_v53  ;;  %v541_v12 = vadd.f32 %v540_v41, %v1618_v33  ;;  %v610_v48 = vld [vmem:[%s1522_s1 + $0x148] sm:$0xff]  ;;  %737 = vmatpush2.msra.mxu0 %v611_v9 }
  0x44   : > { %v416_v60 = vadd.f32 %v415_v20, %v414_v35  ;;  %v442_v56 = vadd.f32 %v441_v62, %v440_v0  ;;  %v1619_v14 = vunpack.c.h.bf16 %v1163_v42  ;;  %v1620_v41 = vunpack.c.h.bf16 %v1205_v24  ;;  %v609_v62 = vld [vmem:[%s1522_s1 + $0x140] sm:$0xff]  ;;  %738 = vmatprep.subr.mxu0 %v610_v48 }
  0x45   : > { %v468_v51 = vadd.f32 %v467_v15, %v466_v17  ;;  %v1621_v2 = vunpack.c.h.bf16 %v1225_v28  ;;  %v396_v20 = vadd.f32 %v395_v47, %v394_v46  ;;  %v608_v15 = vld [vmem:[%s1522_s1 + $0x138] sm:$0xff]  ;;  %v1622_v32 = vunpack.c.h.bf16 %v1231_v1  ;;  %v607_v46 = vld [vmem:[%s1522_s1 + $0x130] sm:$0xff]  ;;  %739 = vmatpush2.msra.mxu0 %v609_v62 }
  0x46   : > { %v492_v55 = vadd.f32 %v491_v4, %v1619_v14  ;;  %v518_v50 = vadd.f32 %v517_v27, %v1620_v41  ;;  %v417_v49 = vrot.slane %v416_v60, 4  ;;  %v443_v35 = vrot.slane %v442_v56, 4  ;;  %740 = vmatprep.subr.mxu0 %v608_v15 }
  0x47   : > { %v542_v52 = vadd.f32 %v541_v12, %v1621_v2  ;;  %v469_v16 = vrot.slane %v468_v51, 4  ;;  %v556_v33 = vmul.f32 0.020408163, %v396_v20  ;;  %v606_v12 = vld [vmem:[%s1522_s1 + $0x128] sm:$0xff]  ;;  %v1623_v47 = vunpack.c.h.bf16 %v1234_v30  ;;  %741 = vmatpush2.msra.mxu0 %v607_v46 }
  0x48   : > { %v494_v0 = vadd.f32 %v493_v40, %v492_v55  ;;  %v520_v4 = vadd.f32 %v519_v19, %v518_v50  ;;  %v418_v53 = vadd.f32 %v417_v49, %v416_v60  ;;  %v444_v27 = vadd.f32 %v443_v35, %v442_v56  ;;  %v605_v60 = vld [vmem:[%s1522_s1 + $0x120] sm:$0xff]  ;;  %742 = vmatprep.subr.mxu0 %v606_v12  ;;  %v603_v49 = vld [vmem:[%s1522_s1 + $0x110] sm:$0xff]  ;;  %v1625_v12 = vld [vmem:[#allocation7_spill] sm:$0xff] }
  0x49   : > { %v543_v17 = vadd.f32 %v542_v52, %v1622_v32  ;;  %v470_v19 = vadd.f32 %v469_v16, %v468_v51  ;;  %v675_v50 = vsel %vm661_vm1, %v556_v33, %v554_v29  ;;  %v604_v51 = vld [vmem:[%s1522_s1 + $0x118] sm:$0xff]  ;;  %743 = vmatpush2.msra.mxu0 %v605_v60  ;;  %v602_v16 = vld [vmem:[%s1522_s1 + $0x108] sm:$0xff] }
  0x4a   : > { %v495_v40 = vrot.slane %v494_v0, 4  ;;  %v521_v9 = vrot.slane %v520_v4, 4  ;;  %v419_v56 = vrot.slane %v418_v53, 2  ;;  %v445_v48 = vrot.slane %v444_v27, 2  ;;  %744 = vmatprep.subr.mxu0 %v604_v51  ;;  %v1627_v51 = vld [vmem:[#allocation9_spill] sm:$0xff] }
  0x4b   : > { %v544_v14 = vadd.f32 %v543_v17, %v1623_v47  ;;  %v471_v2 = vrot.slane %v470_v19, 2  ;;  %v1624_v17 = vld [vmem:[#allocation6_spill] sm:$0xff]  ;;  %745 = vmatpush2.msra.mxu0 %v603_v49 }
  0x4c   : > { %v496_v41 = vadd.f32 %v495_v40, %v494_v0  ;;  %v522_v52 = vadd.f32 %v521_v9, %v520_v4  ;;  %v420_v35 = vadd.f32 %v419_v56, %v418_v53  ;;  %v446_v0 = vadd.f32 %v445_v48, %v444_v27  ;;  %v601_v53 = vld [vmem:[%s1522_s1 + $0x100] sm:$0xff]  ;;  %746 = vmatprep.subr.mxu0 %v602_v16 }
  0x4d   : > { %v546_v62 = vadd.f32 %v545_v54, %v544_v14  ;;  %v472_v54 = vadd.f32 %v471_v2, %v470_v19  ;;  %v1626_v19 = vld [vmem:[#allocation8_spill] sm:$0xff]  ;;  %747 = vmatpush2.msra.mxu0 %v601_v53  ;;  %v264_v53 = vunpack.c.l.bf16 %v1034_v63  ;;  %v1631_v63 = vld [vmem:[#allocation13_spill] sm:$0xff] }
  0x4e   : > { %v497_v15 = vrot.slane %v496_v41, 2  ;;  %v523_v4 = vrot.slane %v522_v52, 2  ;;  %v421_v27 = vrot.slane %v420_v35, 1  ;;  %v447_v40 = vrot.slane %v446_v0, 1 }
  0x4f   : > { %v547_v32 = vrot.slane %v546_v62, 4  ;;  %v473_v47 = vrot.slane %v472_v54, 1 }
  0x50   : > { %v498_v33 = vadd.f32 %v497_v15, %v496_v41  ;;  %v524_v14 = vadd.f32 %v523_v4, %v522_v52  ;;  %v422_v48 = vadd.f32 %v421_v27, %v420_v35  ;;  %v448_v2 = vadd.f32 %v447_v40, %v446_v0  ;;  %v1628_v41 = vld [vmem:[#allocation10_spill] sm:$0xff]  ;;  %v1629_v35 = vld [vmem:[#allocation11_spill] sm:$0xff] }
  0x51   : > { %v548_v60 = vadd.f32 %v547_v32, %v546_v62  ;;  %v474_v46 = vadd.f32 %v473_v47, %v472_v54  ;;  %v260_v52 = vunpack.c.l.bf16 %v1028_v61  ;;  %v262_v0 = vunpack.c.l.bf16 %v1629_v35  ;;  %v1632_v35 = vld [vmem:[#allocation14_spill] sm:$0xff]  ;;  %v1647_v15 = vld [vmem:[#allocation3_spill] sm:$0xff] }
  0x52   : > { %v499_v58 = vrot.slane %v498_v33, 1  ;;  %v525_v29 = vrot.slane %v524_v14, 1  ;;  %v558_v49 = vmul.f32 0.020408163, %v422_v48  ;;  %v560_v55 = vmul.f32 0.020408163, %v448_v2 }
  0x53   : > { %v549_v20 = vrot.slane %v548_v60, 2  ;;  %v562_v16 = vmul.f32 0.020408163, %v474_v46  ;;  %v1630_v46 = vld [vmem:[#allocation12_spill] sm:$0xff]  ;;  %v278_v48 = vunpack.c.l.bf16 %v1076_v21  ;;  %v296_v21 = vunpack.c.l.bf16 %v1123_v34  ;;  %v1638_v34 = vld [vmem:[#allocation22_spill] sm:$0xff] }
  0x54   : > { %v500_v9 = vadd.f32 %v499_v58, %v498_v33  ;;  %v526_v62 = vadd.f32 %v525_v29, %v524_v14  ;;  %v676_v27 = vsel %vm663_vm2, %v558_v49, %v675_v50  ;;  %v272_v29 = vunpack.c.l.bf16 %v1061_v13  ;;  %v1643_v33 = vld [vmem:[#allocation27_spill] sm:$0xff]  ;;  %v1645_v54 = vld [vmem:[#allocation2_spill] sm:$0xff] }
  0x55   : > { %v550_v4 = vadd.f32 %v549_v20, %v548_v60  ;;  %v677_v58 = vsel %vm665_vm3, %v560_v55, %v676_v27  ;;  %v276_v60 = vunpack.c.l.bf16 %v1631_v63  ;;  %v280_v55 = vunpack.c.l.bf16 %v1079_v22  ;;  %v1633_v27 = vld [vmem:[#allocation15_spill] sm:$0xff] }
  0x56   : > { %v564_v32 = vmul.f32 0.020408163, %v500_v9  ;;  %v566_v47 = vmul.f32 0.020408163, %v526_v62  ;;  %v678_v61 = vsel %vm667_vm4, %v562_v16, %v677_v58  ;;  %v274_v9 = vunpack.c.l.bf16 %v1630_v46  ;;  %v1635_v46 = vld [vmem:[#allocation18_spill] sm:$0xff]  ;;  %v1636_v63 = vld [vmem:[#allocation19_spill] sm:$0xff] }
  0x57   : > { %v551_v40 = vrot.slane %v550_v4, 1  ;;  %v286_v13 = vunpack.c.l.bf16 %v1632_v35  ;;  %v288_v58 = vunpack.c.l.bf16 %v1633_v27  ;;  %v1637_v62 = vld [vmem:[#allocation20_spill] sm:$0xff]  ;;  %v306_v27 = vunpack.c.l.bf16 %v1146_v44 }
  0x58   : > { %v679_v50 = vsel %vm669_vm5, %v564_v32, %v678_v61  ;;  %v292_v32 = vunpack.c.l.bf16 %v1111_v3  ;;  %v294_v61 = vunpack.c.l.bf16 %v1114_v59  ;;  %v304_v35 = vunpack.c.l.bf16 %v1637_v62 }
  0x59   : > { %v552_v14 = vadd.f32 %v551_v40, %v550_v4  ;;  %v680_v2 = vsel %vm671_vm6, %v566_v47, %v679_v50  ;;  %v1634_v4 = vld [vmem:[#allocation16_spill] sm:$0xff]  ;;  %v300_v50 = vunpack.c.l.bf16 %v1635_v46  ;;  %v310_v3 = vunpack.c.l.bf16 %v1160_v43  ;;  %v1639_v47 = vld [vmem:[#allocation23_spill] sm:$0xff]  ;;  %v1641_v46 = vld [vmem:[#allocation25_spill] sm:$0xff] }
  0x5a   : > { %v290_v40 = vunpack.c.l.bf16 %v1634_v4  ;;  %v308_v4 = vunpack.c.l.bf16 %v1157_v10  ;;  %v314_v20 = vunpack.c.l.bf16 %v1638_v34  ;;  %v316_v11 = vunpack.c.l.bf16 %v1639_v47 }
  0x5b   : > { %v568_v16 = vmul.f32 0.020408163, %v552_v14  ;;  %v302_v14 = vunpack.c.l.bf16 %v1636_v63  ;;  %v320_v49 = vunpack.c.l.bf16 %v1641_v46  ;;  %v322_v63 = vunpack.c.l.bf16 %v1193_v25  ;;  %v1653_v25 = vld [vmem:[#allocation4_spill] sm:$0xff] }
  0x5c   : > { %v324_v62 = vunpack.c.l.bf16 %v1196_v57  ;;  %v326_v44 = vunpack.c.l.bf16 %v1205_v24  ;;  %v330_v43 = vunpack.c.l.bf16 %v1211_v8  ;;  %v332_v59 = vunpack.c.l.bf16 %v1643_v33 }
  0x5d   : > { %v681_v22 = vsel %vm673_vm7, %v568_v16, %v680_v2  ;;  %v1640_v2 = vld [vmem:[#allocation24_spill] sm:$0xff]  ;;  %v334_v34 = vunpack.c.l.bf16 %v1222_v26  ;;  %v336_v47 = vunpack.c.l.bf16 %v1225_v28  ;;  %v1646_v57 = vunpack.c.l.bf16 %v1645_v54 }
  0x5e   : > { %748 = vmatprep.mubr.f32.mxu0 %v681_v22  ;;  %v318_v16 = vunpack.c.l.bf16 %v1640_v2  ;;  %v1642_v22 = vld [vmem:[#allocation26_spill] sm:$0xff]  ;;  %v338_v2 = vunpack.c.l.bf16 %v1231_v1  ;;  %v1648_v24 = vunpack.c.l.bf16 %v1647_v15  ;;  %v1650_v33 = vunpack.c.l.bf16 %v987_v39 }
  0x5f   : > { %v328_v10 = vunpack.c.l.bf16 %v1642_v22  ;;  %v1649_v22 = vunpack.c.l.bf16 %v984_v38  ;;  %v1651_v26 = vunpack.c.l.bf16 %v997_v45  ;;  %v1652_v1 = vunpack.c.l.bf16 %v1628_v41 }
  0x60   : > { %v344_v42 = vadd.f32 %v1648_v24, %v1646_v57  ;;  %v397_v30 = vadd.f32 %v262_v0, %v260_v52  ;;  %v1654_v56 = vunpack.c.l.bf16 %v1653_v25  ;;  %v402_v15 = vsel %vm349_vm0, %v272_v29, 0.0 }
  0x61   : > { %v350_v8 = vsel %vm349_vm0, %v1649_v22, 0.0  ;;  %v371_v28 = vadd.f32 %v1651_v26, %v1650_v33  ;;  %v376_v46 = vsel %vm349_vm0, %v1652_v1, 0.0  ;;  %v423_v57 = vadd.f32 %v276_v60, %v274_v9  ;;  %v1656_v33 = vld [vmem:[#allocation5_spill] sm:$0xff] }
  0x62   : > { %v345_v54 = vadd.f32 %v344_v42, %v1654_v56  ;;  %v428_v38 = vsel %vm349_vm0, %v286_v13, 0.0  ;;  %v1655_v24 = vunpack.c.l.bf16 %v1624_v17  ;;  %v398_v39 = vadd.f32 %v397_v30, %v264_v53 }
  0x63   : > { %v449_v18 = vadd.f32 %v290_v40, %v288_v58  ;;  %v454_v45 = vsel %vm349_vm0, %v300_v50, 0.0  ;;  %v1657_v41 = vunpack.c.l.bf16 %v1656_v33  ;;  %v424_v1 = vadd.f32 %v423_v57, %v278_v48 }
  0x64   : > { %v372_v22 = vadd.f32 %v371_v28, %v1655_v24  ;;  %v475_v52 = vadd.f32 %v304_v35, %v302_v14  ;;  %v480_v0 = vsel %vm349_vm0, %v314_v20, 0.0  ;;  %v1658_v42 = vunpack.c.l.bf16 %v1625_v12 }
  0x65   : > { %v346_v26 = vadd.f32 %v345_v54, %v1657_v41  ;;  %v1659_v29 = vunpack.c.l.bf16 %v1043_v5  ;;  %v450_v60 = vadd.f32 %v449_v18, %v292_v32  ;;  %v501_v17 = vadd.f32 %v318_v16, %v316_v11 }
  0x66   : > { %v373_v56 = vadd.f32 %v372_v22, %v1658_v42  ;;  %v1660_v30 = vunpack.c.l.bf16 %v971_v31  ;;  %v425_v13 = vadd.f32 %v424_v1, %v280_v55  ;;  %v476_v58 = vadd.f32 %v475_v52, %v306_v27 }
  0x67   : > { %v399_v9 = vadd.f32 %v398_v39, %v1659_v29  ;;  %v506_v40 = vsel %vm349_vm0, %v328_v10, 0.0  ;;  %v1661_v48 = vunpack.c.l.bf16 %v1626_v19  ;;  %v1662_v20 = vunpack.c.l.bf16 %v1046_v6  ;;  %v1670_v39 = vld [vmem:[#allocation21_spill] sm:$0xff] }
  0x68   : > { %v347_v53 = vadd.f32 %v346_v26, %v1660_v30  ;;  %v451_v12 = vadd.f32 %v450_v60, %v294_v61  ;;  %v502_v35 = vadd.f32 %v501_v17, %v320_v49  ;;  %v1663_v5 = vunpack.c.l.bf16 %v981_v37 }
  0x69   : > { %v374_v50 = vadd.f32 %v373_v56, %v1661_v48  ;;  %v400_v14 = vadd.f32 %v399_v9, %v1662_v20  ;;  %v1664_v18 = vunpack.c.l.bf16 %v1082_v23  ;;  %v477_v31 = vadd.f32 %v476_v58, %v308_v4  ;;  %v1668_v23 = vld [vmem:[#allocation17_spill] sm:$0xff] }
  0x6a   : > { %v348_v25 = vadd.f32 %v347_v53, %v1663_v5  ;;  %v527_v32 = vadd.f32 %v332_v59, %v330_v43  ;;  %v1665_v55 = vunpack.c.l.bf16 %v1627_v51  ;;  %v1666_v16 = vunpack.c.l.bf16 %v1049_v7  ;;  %v1674_v58 = vld [vmem:[#allocation29_spill] sm:$0xff] }
  0x6b   : > { %v426_v11 = vadd.f32 %v425_v13, %v1664_v18  ;;  %v452_v10 = vadd.f32 %v451_v12, %v296_v21  ;;  %v503_v28 = vadd.f32 %v502_v35, %v322_v63  ;;  %v1667_v61 = vunpack.c.l.bf16 %v1091_v36 }
  0x6c   : > { %v375_v27 = vadd.f32 %v374_v50, %v1665_v55  ;;  %v401_v19 = vadd.f32 %v400_v14, %v1666_v16  ;;  %v351_v6 = vadd.f32 %v350_v8, %v348_v25  ;;  %v478_v54 = vadd.f32 %v477_v31, %v310_v3 }
  0x6d   : > { %v427_v49 = vadd.f32 %v426_v11, %v1667_v61  ;;  %v528_v37 = vadd.f32 %v527_v32, %v334_v34  ;;  %v1669_v22 = vunpack.c.l.bf16 %v1668_v23  ;;  %v504_v59 = vadd.f32 %v503_v28, %v324_v62 }
  0x6e   : > { %v377_v57 = vadd.f32 %v376_v46, %v375_v27  ;;  %v403_v24 = vadd.f32 %v402_v15, %v401_v19  ;;  %v352_v43 = vrot.slane %v351_v6, 4  ;;  %v1671_v33 = vunpack.c.l.bf16 %v1670_v39 }
  0x6f   : > { %v453_v4 = vadd.f32 %v452_v10, %v1669_v22  ;;  %v429_v51 = vadd.f32 %v428_v38, %v427_v49  ;;  %v529_v41 = vadd.f32 %v528_v37, %v336_v47  ;;  %v505_v26 = vadd.f32 %v504_v59, %v326_v44  ;;  %v1672_v38 = vld [vmem:[#allocation28_spill] sm:$0xff] }
  0x70   : > { %v479_v7 = vadd.f32 %v478_v54, %v1671_v33  ;;  %v378_v21 = vrot.slane %v377_v57, 4  ;;  %v404_v63 = vrot.slane %v403_v24, 4  ;;  %v353_v36 = vadd.f32 %v352_v43, %v351_v6 }
  0x71   : > { %v455_v8 = vadd.f32 %v454_v45, %v453_v4  ;;  %v430_v1 = vrot.slane %v429_v51, 4  ;;  %v530_v34 = vadd.f32 %v529_v41, %v338_v2  ;;  %v507_v42 = vadd.f32 %v506_v40, %v505_v26 }
  0x72   : > { %v481_v3 = vadd.f32 %v480_v0, %v479_v7  ;;  %v379_v46 = vadd.f32 %v378_v21, %v377_v57  ;;  %v405_v15 = vadd.f32 %v404_v63, %v403_v24  ;;  %v354_v56 = vrot.slane %v353_v36, 2 }
  0x73   : > { %v456_v52 = vrot.slane %v455_v8, 4  ;;  %v431_v62 = vadd.f32 %v430_v1, %v429_v51  ;;  %v1673_v9 = vunpack.c.l.bf16 %v1672_v38  ;;  %v508_v53 = vrot.slane %v507_v42, 4 }
  0x74   : > { %v482_v29 = vrot.slane %v481_v3, 4  ;;  %v380_v17 = vrot.slane %v379_v46, 2  ;;  %v406_v47 = vrot.slane %v405_v15, 2  ;;  %v355_v45 = vadd.f32 %v354_v56, %v353_v36 }
  0x75   : > { %v531_v60 = vadd.f32 %v530_v34, %v1673_v9  ;;  %v457_v30 = vadd.f32 %v456_v52, %v455_v8  ;;  %v432_v44 = vrot.slane %v431_v62, 2  ;;  %v1675_v0 = vunpack.c.l.bf16 %v1674_v58 }
  0x76   : > { %v483_v13 = vadd.f32 %v482_v29, %v481_v3  ;;  %v381_v48 = vadd.f32 %v380_v17, %v379_v46  ;;  %v407_v50 = vadd.f32 %v406_v47, %v405_v15  ;;  %v509_v20 = vadd.f32 %v508_v53, %v507_v42 }
  0x77   : > { %v532_v2 = vsel %vm349_vm0, %v1675_v0, 0.0  ;;  %v458_v40 = vrot.slane %v457_v30, 2  ;;  %v356_v14 = vrot.slane %v355_v45, 1  ;;  %v433_v12 = vadd.f32 %v432_v44, %v431_v62  ;;  %v633_v62 = vld [vmem:[%s1523_s2] sm:$0x3] }
  0x78   : > { %v484_v35 = vrot.slane %v483_v13, 2  ;;  %v533_v5 = vadd.f32 %v532_v2, %v531_v60  ;;  %v382_v25 = vrot.slane %v381_v48, 1  ;;  %v408_v18 = vrot.slane %v407_v50, 1 }
  0x79   : > { %v459_v11 = vadd.f32 %v458_v40, %v457_v30  ;;  %v510_v31 = vrot.slane %v509_v20, 2  ;;  %v357_v32 = vadd.f32 %v356_v14, %v355_v45  ;;  %v434_v55 = vrot.slane %v433_v12, 1 }
  0x7a   : > { %v485_v27 = vadd.f32 %v484_v35, %v483_v13  ;;  %v534_v16 = vrot.slane %v533_v5, 4  ;;  %v383_v19 = vadd.f32 %v382_v25, %v381_v48  ;;  %v409_v10 = vadd.f32 %v408_v18, %v407_v50 }
  0x7b   : > { %v460_v28 = vrot.slane %v459_v11, 1  ;;  %v511_v6 = vadd.f32 %v510_v31, %v509_v20  ;;  %v435_v61 = vadd.f32 %v434_v55, %v433_v12  ;;  %v553_v37 = vmul.f32 0.020408163, %v357_v32 }
  0x7c   : > { %v486_v49 = vrot.slane %v485_v27, 1  ;;  %v535_v54 = vadd.f32 %v534_v16, %v533_v5  ;;  %v555_v23 = vmul.f32 0.020408163, %v383_v19  ;;  %v557_v22 = vmul.f32 0.020408163, %v409_v10 }
  0x7d   : > { %v461_v57 = vadd.f32 %v460_v28, %v459_v11  ;;  %v512_v24 = vrot.slane %v511_v6, 1  ;;  %v559_v43 = vmul.f32 0.020408163, %v435_v61  ;;  %v635_v52 = vlaneseq }
  0x7e   : > { %v487_v4 = vadd.f32 %v486_v49, %v485_v27  ;;  %v536_v59 = vrot.slane %v535_v54, 2  ;;  %v662_v33 = vsel %vm661_vm1, %v555_v23, %v553_v37 }
  0x7f   : > { %v513_v51 = vadd.f32 %v512_v24, %v511_v6  ;;  %v561_v39 = vmul.f32 0.020408163, %v461_v57  ;;  %v664_v21 = vsel %vm663_vm2, %v557_v22, %v662_v33  ;;  %v636_v42 = vshrl.u32 %v635_v52, 7 }
  0x80   : > { %v537_v7 = vadd.f32 %v536_v59, %v535_v54  ;;  %v563_v41 = vmul.f32 0.020408163, %v487_v4  ;;  %v666_v8 = vsel %vm665_vm3, %v559_v43, %v664_v21 }
  0x81   : > { %v565_v63 = vmul.f32 0.020408163, %v513_v51  ;;  %v668_v36 = vsel %vm667_vm4, %v561_v39, %v666_v8  ;;  %v637_v56 = vsub.s32 0, %v636_v42  ;;  %v641_v29 = vsub.s32 1, %v636_v42 }
  0x82   : > { %v538_v26 = vrot.slane %v537_v7, 1  ;;  %v670_v1 = vsel %vm669_vm5, %v563_v41, %v668_v36 }
  0x83   : > { %v672_v34 = vsel %vm671_vm6, %v565_v63, %v670_v1  ;;  %v638_v38 = vrot.slane %v633_v62, %v637_v56  ;;  %v642_v9 = vrot.slane %v633_v62, %v641_v29 }
  0x84   : > { %v539_v3 = vadd.f32 %v538_v26, %v537_v7 }
  0x86   : > { %v567_v46 = vmul.f32 0.020408163, %v539_v3 }
  0x88   : > { %v674_v15 = vsel %vm673_vm7, %v567_v46, %v672_v34 }
  0x89   : > { %749 = vmatmul.mubr.f32.vlgmr.msra.gmra.mxu0 %v674_v15 }
 0x149   : > { %v750_v60 = vpop.f32.mrf.mxu0 }
 0x14a   : > { %v751_v17 = vadd.f32 %v750_v60, %v638_v38 }
 0x14b   : > { %v752_v47 = vpop.f32.mrf.mxu0 }
 0x14c   : > { %755 = vst [vmem:[%s175_s29] sm:$0xff] %v751_v17  ;;  %v753_v30 = vadd.f32 %v752_v47, %v642_v9 }
 0x14e   : > { %756 = vst [vmem:[%s175_s29 + $0x8] sm:$0xff] %v753_v30 }
 0x14f PF: > { %s13_s12 = sadd.s32 1, %s839_s12  }
 0x150   : > { %p10_p5 = scmp.ge.s32.totalorder %s13_s12, 4  }
 0x152   :  { %12 = sbr.rel (!%p10_p5) target bundleno = 1 (0x1), region = 62 }

</bundles_post_ra>
